<compile_context>
chip_gen: v5e
topology: v5e:2x2
jax: 0.10.0
libtpu: 0.0.40
codegen_flags: <defaults>
</compile_context>

<pallas_src>
import math

import jax
import jax.numpy as jnp
from jax.experimental import pallas as pl
from jax.experimental.pallas import tpu as pltpu


def _build_pe(d_model: int, max_len: int = 5000) -> jnp.ndarray:
    """Deterministic sinusoidal table, identical to the PyTorch __init__."""
    position = jnp.arange(0, max_len, dtype=jnp.float32)[:, None]            # (L, 1)
    div_term = jnp.exp(
        jnp.arange(0, d_model, 2, dtype=jnp.float32) * (-math.log(10000.0) / d_model)
    )                                                                         # (ceil(D/2),)
    angles = position * div_term                                              # (L, ceil(D/2))
    pe = jnp.zeros((max_len, d_model), dtype=jnp.float32)
    pe = pe.at[:, 0::2].set(jnp.sin(angles))
    if d_model % 2 != 0:
        pe = pe.at[:, 1::2].set(jnp.cos(angles)[:, :-1])
    else:
        pe = pe.at[:, 1::2].set(jnp.cos(angles))
    return pe                                                                 # (L, D)


def _pe_add_kernel(x_ref, pe_ref, o_ref):
    # x_ref / o_ref: (TS, TB, D) tiles in VMEM; pe_ref: (TS, 1, D) tile in VMEM.
    # The batch (sublane) broadcast happens on-chip — VPU slack is ample in a
    # memory-bound kernel — so pe HBM traffic stays seq*d_model.
    o_ref[...] = x_ref[...] + pe_ref[...]


def _choose_tiles(seq_len: int, batch: int, d_model: int, itemsize: int):
    """Pick (seq_tile, batch_tile) targeting ~4 MiB x/out tiles.

    With Pallas double-buffering, VMEM holds roughly 2*(x tile) + 2*(out tile)
    + 2*(pe tile); ~4 MiB x tiles keep that comfortably under the 32 MiB
    scoped-VMEM default on v5e/v6e and under v7x's 64 MiB physical VMEM, while
    remaining on the large-tile HBM-roofline plateau (>=85%).
    """
    target = 4 * 1024 * 1024

    # Batch tiling only when the resulting (TB, D) trailing block dims stay
    # legal under the (8, 128) layout constraint; never triggers for small
    # batches or non-lane-aligned d_model.
    tb = batch
    if (batch * d_model * itemsize > target
            and d_model % 128 == 0 and batch % 8 == 0):
        while (tb > 8 and tb % 2 == 0 and (tb // 2) % 8 == 0
               and tb * d_model * itemsize > target):
            tb //= 2

    row_bytes = max(tb * d_model * itemsize, 1)
    ts = max(1, target // row_bytes)
    if ts >= seq_len:
        ts = seq_len                      # single seq block covers everything
    else:
        # Keep seq tiles 8-aligned (leading dim; cheap and keeps DMAs tidy).
        ts = max(8, (ts // 8) * 8)
        ts = min(ts, seq_len)
    return ts, tb


def positional_encoding_forward(x: jnp.ndarray, pe_table: jnp.ndarray) -> jnp.ndarray:
    """x: [seq_len, batch, d_model]; pe_table: [max_len, d_model]."""
    seq_len, batch, d_model = x.shape
    # Static slice + dtype match + middle broadcast axis, in plain JAX (glue,
    # not the hot path).  pe stays [S, 1, D] — never pre-broadcast over batch.
    pe_slice = pe_table[:seq_len, :].astype(x.dtype)[:, None, :]

    ts, tb = _choose_tiles(seq_len, batch, d_model, x.dtype.itemsize)
    grid = (pl.cdiv(seq_len, ts), pl.cdiv(batch, tb))     # batch axis innermost

    # NOTE: when d_model < 128 (as in the demo shapes) the trailing lanes of
    # each vreg/store are masked; typical transformer d_model >= 128 is
    # lane-dense.  Flattening to (S, B*D) would force pre-broadcasting pe over
    # batch (batch-x more pe HBM reads), so the natural layout is kept.
    return pl.pallas_call(
        _pe_add_kernel,
        out_shape=jax.ShapeDtypeStruct((seq_len, batch, d_model), x.dtype),
        grid=grid,
        in_specs=[
            pl.BlockSpec((ts, tb, d_model), lambda s, b: (s, b, 0)),
            # pe index_map ignores the batch grid index -> the pe tile stays
            # resident in VMEM across the inner batch iterations (no re-DMA).
            pl.BlockSpec((ts, 1, d_model), lambda s, b: (s, 0, 0)),
        ],
        out_specs=pl.BlockSpec((ts, tb, d_model), lambda s, b: (s, b, 0)),
        # In-place add on x's HBM buffer: no extra full-size output allocation.
        input_output_aliases={0: 0},
        compiler_params=pltpu.CompilerParams(
            # Pure elementwise map, no reduction axis -> both axes parallel
            # (sharded across the 2 TensorCores on v7x; neutral on v5e/v6e).
            dimension_semantics=("parallel", "parallel"),
        ),
    )(x, pe_slice)


if __name__ == "__main__":
    d_model = 32
    seq_len = 8
    batch = 2
    max_len = 5000

    key = jax.random.PRNGKey(0)
    x = jax.random.normal(key, (seq_len, batch, d_model), dtype=jnp.float32)

    pe_table = _build_pe(d_model, max_len)

    # Pure-JAX reference, computed before the kernel call (the kernel aliases
    # x's buffer for its output).
    ref = x + pe_table[:seq_len, :][:, None, :]
    ref = jax.block_until_ready(ref)

    out = positional_encoding_forward(x, pe_table)
    out = jax.block_until_ready(out)

    assert out.shape == (seq_len, batch, d_model)
    assert jnp.allclose(out, ref, atol=1e-6), "mismatch vs reference"

    print("KERNEL_OK")
</pallas_src>

<mosaic_0001>
module attributes {stable_mosaic.version = 11 : i64} {
  func.func @_pe_add_kernel(%arg0: i32, %arg1: i32, %arg2: memref<8x2x32xf32, #tpu.memory_space<vmem>>, %arg3: memref<8x1x32xf32, #tpu.memory_space<vmem>>, %arg4: memref<8x2x32xf32, #tpu.memory_space<vmem>>) attributes {dimension_semantics = [#tpu.dimension_semantics<parallel>, #tpu.dimension_semantics<parallel>], iteration_bounds = array<i64: 1, 1>, scalar_prefetch = 0 : i64, scratch_operands = 0 : i64, tpu.core_type = #tpu.core_type<tc>, window_params = [{transform_indices = @transform_0, window_bounds = array<i64: 8, 2, 32>}, {transform_indices = @transform_1, window_bounds = array<i64: 8, 1, 32>}, {transform_indices = @transform_2, window_bounds = array<i64: 8, 2, 32>}]} {
    %c0 = arith.constant 0 : index
    %c0_0 = arith.constant 0 : index
    %c0_1 = arith.constant 0 : index
    %0 = vector.load %arg2[%c0, %c0_0, %c0_1] : memref<8x2x32xf32, #tpu.memory_space<vmem>>, vector<8x2x32xf32>
    %c0_2 = arith.constant 0 : index
    %c0_3 = arith.constant 0 : index
    %c0_4 = arith.constant 0 : index
    %1 = vector.load %arg3[%c0_2, %c0_3, %c0_4] : memref<8x1x32xf32, #tpu.memory_space<vmem>>, vector<8x1x32xf32>
    %2 = vector.broadcast %1 : vector<8x1x32xf32> to vector<8x2x32xf32>
    %3 = arith.addf %0, %2 : vector<8x2x32xf32>
    %c0_5 = arith.constant 0 : index
    %c0_6 = arith.constant 0 : index
    %c0_7 = arith.constant 0 : index
    %4 = vector.load %arg4[%c0_5, %c0_6, %c0_7] : memref<8x2x32xf32, #tpu.memory_space<vmem>>, vector<8x2x32xf32>
    tpu.vector_store %arg4[%c0_5, %c0_6, %c0_7], %3 {strides = array<i32>} : memref<8x2x32xf32, #tpu.memory_space<vmem>>, vector<8x2x32xf32>,
    return
  }
  func.func @transform_0(%arg0: i32, %arg1: i32) -> (i32, i32, i32) {
    %c0_i32 = arith.constant 0 : i32
    %c0_i32_0 = arith.constant 0 : i32
    return %arg0, %arg1, %c0_i32 : i32, i32, i32
  }
  func.func @transform_1(%arg0: i32, %arg1: i32) -> (i32, i32, i32) {
    %c0_i32 = arith.constant 0 : i32
    %c0_i32_0 = arith.constant 0 : i32
    %c0_i32_1 = arith.constant 0 : i32
    return %arg0, %c0_i32, %c0_i32_0 : i32, i32, i32
  }
  func.func @transform_2(%arg0: i32, %arg1: i32) -> (i32, i32, i32) {
    %c0_i32 = arith.constant 0 : i32
    %c0_i32_0 = arith.constant 0 : i32
    return %arg0, %arg1, %c0_i32 : i32, i32, i32
  }
}

</mosaic_0001>

<bundles_post_ra>
// kernel: tpu_custom_call.1
= control target key start
LH: loop header
LB: loop body
LE: loop exit
PB: predicated region body
PF: predicated region fallthrough
CT: control target
= control target key end

     0   :  { %7 = vsyncpa [#allocation3], 0  ;;  %s238_s0 = inlined_call_operand.hbm [shape: f32[8,2,32], index: 0, kind: input, shape index: {}, may-alias: {0,2}]   ;;  %s239_s1 = inlined_call_operand.vmem [shape: f32[8,1,32], index: 1, kind: input, shape index: {}]   ;;  %s240_s2 = inlined_call_operand.hbm [shape: f32[8,2,32], index: 2, kind: output, shape index: {}, may-alias: {0,2}]  }
   0x1   :  { %8 = vsyncpa [#allocation4], 0  ;;  %s13_s11 = sshll.u32 %s238_s0, 4  ;;  %s168_s12 = smov [#allocation2]   ;;  %s14_s11 = int_to_ptr.hbm [resolvable:$true] %s13_s11 }
   0x2   :  { %s15_s13 = sshll.u32 %s168_s12, 4  ;;  %s169_s14 = smov 32   ;;  %s16_s13 = int_to_ptr.vmem [resolvable:$true] %s15_s13 }
   0x3   :  { %s170_s15 = smov 2  }
   0x4   :  { %21 = dma.hbm_to_vmem [thread:$0]  %s14_s11, 256, %s16_s13, [#allocation3], %s169_s14, %s169_s14, %s170_s15  }
   0x5   :  { %164 = dma.done.wait [#allocation3], 256  }
   0x6   :  { %165 = vsyncadd [#allocation3], 4294967040  ;;  %vm76_vm0 = vcmask 254976   ;;  %s171_s16 = smov [#allocation5]   ;;  %s91_s0 = sshll.u32 %s240_s2, 4  ;;  %s92_s0 = int_to_ptr.hbm [resolvable:$true] %s91_s0 }
   0x7   :  { %s193_s17 = sshll.u32 %s171_s16, 4  ;;  %v28_v0 = vld [vmem:[#allocation2] sm:$0x3]  ;;  %v29_v2 = vld [vmem:[#allocation2 + $0x2] sm:$0x3]  ;;  %s90_s17 = int_to_ptr.vmem [resolvable:$true] %s193_s17 }
   0x8   :  { %v108_v1 = vld [vmem:[%s239_s1] ss:$0 sm:$0xff]  ;;  %v109_v3 = vld [vmem:[%s239_s1 + $0x1] ss:$0 sm:$0xff]  ;;  %v30_v5 = vld [vmem:[#allocation2 + $0x4] sm:$0x3] }
   0x9   :  { %v68_v4 = vadd.f32 %v108_v1, %v28_v0  ;;  %v110_v6 = vld [vmem:[%s239_s1 + $0x2] ss:$0 sm:$0xff]  ;;  %v69_v7 = vadd.f32 %v109_v3, %v29_v2  ;;  %v31_v8 = vld [vmem:[#allocation2 + $0x6] sm:$0x3]  ;;  %v111_v9 = vld [vmem:[%s239_s1 + $0x3] ss:$0 sm:$0xff] }
   0xa   :  { %v70_v10 = vadd.f32 %v110_v6, %v30_v5  ;;  %v32_v11 = vld [vmem:[#allocation2 + $0x8] sm:$0x3]  ;;  %v71_v12 = vadd.f32 %v111_v9, %v31_v8  ;;  %v112_v13 = vld [vmem:[%s239_s1 + $0x4] ss:$0 sm:$0xff]  ;;  %v33_v14 = vld [vmem:[#allocation2 + $0xa] sm:$0x3] }
   0xb   :  { %77 = vst.msk [vmem:[#allocation5] sm:$0x3] %vm76_vm0, %v68_v4  ;;  %v113_v15 = vld [vmem:[%s239_s1 + $0x5] ss:$0 sm:$0xff]  ;;  %v72_v16 = vadd.f32 %v112_v13, %v32_v11  ;;  %v34_v17 = vld [vmem:[#allocation2 + $0xc] sm:$0x3] }
   0xc   :  { %78 = vst.msk [vmem:[#allocation5 + $0x2] sm:$0x3] %vm76_vm0, %v69_v7  ;;  %v73_v18 = vadd.f32 %v113_v15, %v33_v14  ;;  %v114_v19 = vld [vmem:[%s239_s1 + $0x6] ss:$0 sm:$0xff]  ;;  %v35_v20 = vld [vmem:[#allocation2 + $0xe] sm:$0x3] }
   0xd   :  { %79 = vst.msk [vmem:[#allocation5 + $0x4] sm:$0x3] %vm76_vm0, %v70_v10  ;;  %v115_v21 = vld [vmem:[%s239_s1 + $0x7] ss:$0 sm:$0xff]  ;;  %v74_v22 = vadd.f32 %v114_v19, %v34_v17 }
   0xe   :  { %80 = vst.msk [vmem:[#allocation5 + $0x6] sm:$0x3] %vm76_vm0, %v71_v12  ;;  %v75_v23 = vadd.f32 %v115_v21, %v35_v20 }
   0xf   :  { %81 = vst.msk [vmem:[#allocation5 + $0x8] sm:$0x3] %vm76_vm0, %v72_v16 }
  0x10   :  { %82 = vst.msk [vmem:[#allocation5 + $0xa] sm:$0x3] %vm76_vm0, %v73_v18 }
  0x11   :  { %83 = vst.msk [vmem:[#allocation5 + $0xc] sm:$0x3] %vm76_vm0, %v74_v22 }
  0x12   :  { %84 = vst.msk [vmem:[#allocation5 + $0xe] sm:$0x3] %vm76_vm0, %v75_v23 }
  0x13   :  { %97 = dma.vmem_to_hbm [thread:$0]  %s90_s17, 256, %s92_s0, [#allocation4], %s169_s14, %s169_s14, %s170_s15  }
  0x14   :  { %166 = dma.done.wait [#allocation4], 256  }
  0x15   :  { %167 = vsyncadd [#allocation4], 4294967040 }
  0x16   :  { %102 = vsyncpa [#allocation3], 1 }
  0x17   :  { %103 = vsyncpa [#allocation4], 1 }

</bundles_post_ra>
